<compile_context>
chip_gen: v5e
topology: v5e:2x2
jax: 0.10.0
libtpu: 0.0.40
codegen_flags: <defaults>
</compile_context>

<pallas_src>
import functools

import jax
import jax.numpy as jnp
from jax import lax
from jax.experimental import pallas as pl
from jax.experimental.pallas import tpu as pltpu


def _round_up(x, m):
    return (x + m - 1) // m * m


def _sublane_pack(dtype):
    # rows per packed sublane word: 8 for f32, 16 for bf16, 32 for int8/fp8
    return max(8, 32 // jnp.dtype(dtype).itemsize)


def _mlp_kernel(x_ref, w_fc_ref, w_proj_ref, o_ref, h_ref):
    """One (tm, D) tile of tokens against fully-resident weights.

    x_ref:      (tm, D)  tokens (compute dtype)
    w_fc_ref:   (H, D)   c_fc weight, PyTorch (out, in) layout
    w_proj_ref: (D, H)   c_proj weight, PyTorch (out, in) layout
    o_ref:      (tm, D)  output tile
    h_ref:      (tm, H)  VMEM scratch for the hidden activation
    """
    # h = x @ W_fc.T  (contract on D); MXU accumulates in f32.
    h = lax.dot_general(
        x_ref[...], w_fc_ref[...],
        dimension_numbers=(((1,), (1,)), ((), ())),
        preferred_element_type=jnp.float32)
    h = jnp.maximum(h, 0.0)
    # relu(h)^2 in f32, staged into VMEM in the compute dtype for the 2nd dot.
    h_ref[...] = (h * h).astype(h_ref.dtype)
    # y = relu(h)^2 @ W_proj.T  (contract on H).
    y = lax.dot_general(
        h_ref[...], w_proj_ref[...],
        dimension_numbers=(((1,), (1,)), ((), ())),
        preferred_element_type=jnp.float32)
    o_ref[...] = y.astype(o_ref.dtype)


def _resident_weight_spec(shape):
    """BlockSpec for a weight block whose index never changes over the grid.

    Single-buffer it (pl.Buffered(1)) to halve its VMEM footprint; fall back
    to the default double-buffered spec if this build lacks pipeline_mode.
    """
    index_map = lambda i: (0, 0)
    try:
        return pl.BlockSpec(shape, index_map, pipeline_mode=pl.Buffered(1))
    except Exception:  # older Pallas without pipeline_mode / Buffered
        return pl.BlockSpec(shape, index_map)


@functools.partial(jax.jit, static_argnames=("tm",))
def mlp_forward(x, w_fc, w_proj, *, tm=256):
    """Fused MLP forward: relu(x @ w_fc.T)**2 @ w_proj.T.

    x:      (B, T, D)   compute dtype follows x, like F.linear(x, W.to(x.dtype))
    w_fc:   (H, D)      H = 4*D, PyTorch nn.Linear (out, in) layout
    w_proj: (D, H)
    """
    B, T, D = x.shape
    H, D2 = w_fc.shape
    assert D2 == D and w_proj.shape == (D, H)

    compute_dtype = x.dtype
    M = B * T

    # Row tile: as large as requested, multiple of the sublane pack, <= padded M.
    pack = _sublane_pack(compute_dtype)
    tm = max(pack, min(_round_up(tm, pack), _round_up(M, pack)))
    Mp = _round_up(M, tm)

    x2 = x.reshape(M, D)
    if Mp != M:
        x2 = jnp.pad(x2, ((0, Mp - M), (0, 0)))

    # Weights stay in (out, in) layout -- no transpose pass. The cast is a
    # no-op when params are already stored in the compute dtype (bf16 training).
    w1 = w_fc.astype(compute_dtype)
    w2 = w_proj.astype(compute_dtype)

    itemsize = jnp.dtype(compute_dtype).itemsize
    w_bytes = 2 * H * D * itemsize                 # both weights resident
    io_bytes = 2 * 2 * tm * D * itemsize           # double-buffered x / out tiles
    h_bytes = tm * H * itemsize                    # hidden-activation scratch
    # Budget assumes worst case (double-buffered weights) plus headroom.
    vmem_limit_bytes = min(2 * w_bytes + io_bytes + h_bytes + (8 << 20),
                           100 << 20)
    # TODO(synk): for very large D/H (resident weights > ~48 MiB) add an
    # H-tiling grid axis with an f32 accumulator so the kernel stays within
    # v7x's 64 MiB physical VMEM.

    flops = 4 * Mp * D * H                         # two (Mp, D, H) matmuls
    bytes_accessed = 2 * Mp * D * itemsize + w_bytes

    out = pl.pallas_call(
        _mlp_kernel,
        out_shape=jax.ShapeDtypeStruct((Mp, D), x.dtype),
        grid_spec=pltpu.PrefetchScalarGridSpec(
            num_scalar_prefetch=0,
            grid=(Mp // tm,),
            in_specs=[
                pl.BlockSpec((tm, D), lambda i: (i, 0)),
                _resident_weight_spec((H, D)),
                _resident_weight_spec((D, H)),
            ],
            out_specs=pl.BlockSpec((tm, D), lambda i: (i, 0)),
            scratch_shapes=[pltpu.VMEM((tm, H), compute_dtype)],
        ),
        compiler_params=pltpu.CompilerParams(
            dimension_semantics=("parallel",),
            vmem_limit_bytes=vmem_limit_bytes,
        ),
        cost_estimate=pl.CostEstimate(
            flops=flops, transcendentals=0, bytes_accessed=bytes_accessed),
    )(x2, w1, w2)

    if Mp != M:
        out = out[:M]
    return out.reshape(B, T, D)


def mlp_reference(x, w_fc, w_proj):
    """Pure-JAX reference mirroring the kernel's numerics."""
    cd = x.dtype
    xf = x.reshape(-1, x.shape[-1])
    w1 = w_fc.astype(cd)
    w2 = w_proj.astype(cd)
    h = lax.dot_general(xf, w1, (((1,), (1,)), ((), ())),
                        preferred_element_type=jnp.float32)
    h = jnp.square(jnp.maximum(h, 0.0)).astype(cd)
    y = lax.dot_general(h, w2, (((1,), (1,)), ((), ())),
                        preferred_element_type=jnp.float32)
    return y.astype(x.dtype).reshape(x.shape)


if __name__ == "__main__":
    # Small but lane-dense demo shapes: D is a multiple of 128 so the output
    # tile's last dim maps densely onto the 128-lane axis.
    B, T, D = 4, 64, 128
    H = 4 * D

    key = jax.random.PRNGKey(0)
    kx, k1, k2 = jax.random.split(key, 3)

    # Activations in bf16 (as in the speedrun's mixed-precision training);
    # params stored in f32 a la nn.Linear and cast to x.dtype (CastedLinear).
    x = jax.random.normal(kx, (B, T, D), dtype=jnp.float32).astype(jnp.bfloat16)

    bound = 1.0 / float(D) ** 0.5
    w_fc = jax.random.uniform(k1, (H, D), dtype=jnp.float32,
                              minval=-bound, maxval=bound)
    # Random c_proj for validation (the module's zero-init would make the
    # output identically zero and hide bugs in the 2nd matmul / relu^2 path).
    w_proj = jax.random.uniform(k2, (D, H), dtype=jnp.float32,
                                minval=-bound, maxval=bound)

    y = jax.block_until_ready(mlp_forward(x, w_fc, w_proj, tm=128))
    y_ref = mlp_reference(x, w_fc, w_proj)

    assert y.shape == (B, T, D) and y.dtype == x.dtype
    assert jnp.allclose(y.astype(jnp.float32), y_ref.astype(jnp.float32),
                        atol=2e-2, rtol=2e-2), "kernel mismatch vs reference"

    # The module's actual init: c_proj is zero-initialized => output is zero.
    y0 = jax.block_until_ready(
        mlp_forward(x, w_fc, jnp.zeros((D, H), jnp.float32)))
    assert jnp.all(y0.astype(jnp.float32) == 0.0)

    print("KERNEL_OK")
</pallas_src>

<mosaic_0001>
module attributes {stable_mosaic.version = 11 : i64} {
  func.func @_mlp_kernel(%arg0: i32, %arg1: memref<128x128xbf16, #tpu.memory_space<vmem>>, %arg2: memref<512x128xbf16, #tpu.memory_space<vmem>>, %arg3: memref<128x512xbf16, #tpu.memory_space<vmem>>, %arg4: memref<128x128xbf16, #tpu.memory_space<vmem>>, %arg5: memref<128x512xbf16, #tpu.memory_space<vmem>>) attributes {dimension_semantics = [#tpu.dimension_semantics<parallel>], iteration_bounds = array<i64: 2>, scalar_prefetch = 0 : i64, scratch_operands = 1 : i64, tpu.core_type = #tpu.core_type<tc>, window_params = [{transform_indices = @transform_0, window_bounds = array<i64: 128, 128>}, {pipeline_mode = #tpu.pipeline_mode<synchronous>, transform_indices = @transform_1, window_bounds = array<i64: 512, 128>}, {pipeline_mode = #tpu.pipeline_mode<synchronous>, transform_indices = @transform_2, window_bounds = array<i64: 128, 512>}, {transform_indices = @transform_3, window_bounds = array<i64: 128, 128>}]} {
    %c0 = arith.constant 0 : index
    %c0_0 = arith.constant 0 : index
    %0 = vector.load %arg1[%c0, %c0_0] : memref<128x128xbf16, #tpu.memory_space<vmem>>, vector<128x128xbf16>
    %c0_1 = arith.constant 0 : index
    %c0_2 = arith.constant 0 : index
    %1 = vector.load %arg2[%c0_1, %c0_2] : memref<512x128xbf16, #tpu.memory_space<vmem>>, vector<512x128xbf16>
    %cst = arith.constant dense<0.000000e+00> : vector<128x512xf32>
    %2 = tpu.matmul %0, %1, %cst {dimension_numbers = #tpu.dot_dimension_numbers<[1], [1], [0], [0], [0, 0, 1, 0], [], []>} : vector<128x128xbf16>, vector<512x128xbf16>, vector<128x512xf32> -> vector<128x512xf32>
    %cst_3 = arith.constant 0.000000e+00 : f32
    %3 = vector.broadcast %cst_3 : f32 to vector<128x512xf32>
    %4 = arith.maximumf %2, %3 : vector<128x512xf32>
    %5 = arith.mulf %4, %4 : vector<128x512xf32>
    %6 = arith.truncf %5 : vector<128x512xf32> to vector<128x512xbf16>
    %c0_4 = arith.constant 0 : index
    %c0_5 = arith.constant 0 : index
    %7 = vector.load %arg5[%c0_4, %c0_5] : memref<128x512xbf16, #tpu.memory_space<vmem>>, vector<128x512xbf16>
    tpu.vector_store %arg5[%c0_4, %c0_5], %6 {strides = array<i32>} : memref<128x512xbf16, #tpu.memory_space<vmem>>, vector<128x512xbf16>,
    %c0_6 = arith.constant 0 : index
    %c0_7 = arith.constant 0 : index
    %8 = vector.load %arg5[%c0_6, %c0_7] : memref<128x512xbf16, #tpu.memory_space<vmem>>, vector<128x512xbf16>
    %c0_8 = arith.constant 0 : index
    %c0_9 = arith.constant 0 : index
    %9 = vector.load %arg3[%c0_8, %c0_9] : memref<128x512xbf16, #tpu.memory_space<vmem>>, vector<128x512xbf16>
    %cst_10 = arith.constant dense<0.000000e+00> : vector<128x128xf32>
    %10 = tpu.matmul %8, %9, %cst_10 {dimension_numbers = #tpu.dot_dimension_numbers<[1], [1], [0], [0], [0, 0, 1, 0], [], []>} : vector<128x512xbf16>, vector<128x512xbf16>, vector<128x128xf32> -> vector<128x128xf32>
    %11 = arith.truncf %10 : vector<128x128xf32> to vector<128x128xbf16>
    %c0_11 = arith.constant 0 : index
    %c0_12 = arith.constant 0 : index
    %12 = vector.load %arg4[%c0_11, %c0_12] : memref<128x128xbf16, #tpu.memory_space<vmem>>, vector<128x128xbf16>
    tpu.vector_store %arg4[%c0_11, %c0_12], %11 {strides = array<i32>} : memref<128x128xbf16, #tpu.memory_space<vmem>>, vector<128x128xbf16>,
    return
  }
  func.func @transform_0(%arg0: i32) -> (i32, i32) {
    %c0_i32 = arith.constant 0 : i32
    %c0_i32_0 = arith.constant 0 : i32
    return %arg0, %c0_i32 : i32, i32
  }
  func.func @transform_1(%arg0: i32) -> (i32, i32) {
    %c0_i32 = arith.constant 0 : i32
    %c0_i32_0 = arith.constant 0 : i32
    %c0_i32_1 = arith.constant 0 : i32
    return %c0_i32, %c0_i32_0 : i32, i32
  }
  func.func @transform_2(%arg0: i32) -> (i32, i32) {
    %c0_i32 = arith.constant 0 : i32
    %c0_i32_0 = arith.constant 0 : i32
    %c0_i32_1 = arith.constant 0 : i32
    return %c0_i32, %c0_i32_0 : i32, i32
  }
  func.func @transform_3(%arg0: i32) -> (i32, i32) {
    %c0_i32 = arith.constant 0 : i32
    %c0_i32_0 = arith.constant 0 : i32
    return %arg0, %c0_i32 : i32, i32
  }
}

</mosaic_0001>

<bundles_post_ra>
// kernel: mlp_forward.1
= control target key start
LH: loop header
LB: loop body
LE: loop exit
PB: predicated region body
PF: predicated region fallthrough
CT: control target
= control target key end

     0   :  { %8 = vsyncpa [#allocation4], 0  ;;  %s2674_s0 = inlined_call_operand.vmem [shape: bf16[256,128], index: 0, kind: input, shape index: {}]   ;;  %s2675_s1 = inlined_call_operand.vmem [shape: bf16[512,128], index: 1, kind: input, shape index: {}]   ;;  %s2676_s2 = inlined_call_operand.vmem [shape: bf16[128,512], index: 2, kind: input, shape index: {}]   ;;  %s2677_s3 = inlined_call_operand.hbm [shape: bf16[256,128], index: 3, kind: output, shape index: {}]  }
   0x1   :  { %10 = vsyncpa [#allocation4 + $0x1], 0  ;;  %s2277_s12 = smov 0   ;;  %s2279_s13 = smov 0  }
   0x2   :  { %s2281_s14 = smov 0   ;;  %s2283_s15 = smov 0  }
   0x3 LB: > { %s2298_s16 = sadd.s32 4294967295, %s2253_s15   ;;  %s1570_s17 = sadd.s32 4294967294, %s2253_s15   ;;  %s2253_s15 = sphi %s2283_s15, %s2683_s15   ;;  %s2249_s14 = sphi %s2281_s14, %s2682_s14   ;;  %s2245_s13 = sphi %s2279_s13, %s2681_s13   ;;  %s2241_s12 = sphi %s2277_s12, %s2680_s12  }
   0x4   : > { %s2302_s18 = sadd.s32 1, %s2253_s15   ;;  %s91_s19 = sadd.s32 1, %s2249_s14 }
   0x5   : > { %s88_s20 = ssub.s32 %s2253_s15, %s2302_s18  ;;  %p101_p0 = scmp.ne.s32.totalorder %s2249_s14, %s2245_s13 }
   0x6   : > { %p89_p1 = scmp.eq.s32.totalorder %s88_s20, 0  ;;  %p102_p2 = scmp.eq.s32.totalorder %s2298_s16, 1 }
   0x7   : > { %p107_p3 = scmp.ne.s32.totalorder %s2245_s13, %s2241_s12  ;;  %p108_p4 = scmp.eq.s32.totalorder %s1570_s17, 1 }
   0x8   : > { %s2313_s21 = scalar_select %p89_p1, %s2249_s14, %s91_s19  }
   0x9   : > { %p2315_p5 = por %p102_p2, %p101_p0  ;;  %p2319_p6 = por %p108_p4, %p107_p3 }
   0xa   : > { %p1573_p7 = scmp.ge.s32.totalorder %s2253_s15, 1  ;;  %p141_p8 = scmp.lt.s32.totalorder %s2253_s15, 3 }
   0xc   : > { %p142_p9 = pnand %p1573_p7, %p141_p8 }
   0xd   : > { %s1575_s9 = sshll.u32 (!%p142_p9), %s2298_s16, 4  ;;  %s2102_s5 = sshll.u32 (!%p142_p9), %s2298_s16, 6 }
   0xe   : > { %145 = sbr.rel (%p142_p9) target bundleno = 504 (0x1f8), region = 32  ;;  %p166_p10 = scmp.lt.s32.totalorder (!%p142_p9), %s1575_s9, 31 }
   0xf   : > { %s1504_s8 = scalar_lea.hbm (!%p142_p9), %s2677_s3, %s2102_s5  ;;  %s2211_s24 = scalar_lea.hbm (!%p142_p9), %s2677_s3, 128 }
  0x10   : > { %s1507_s11 = sshll.u32 (!%p142_p9), %s1504_s8, 4  ;;  %s1508_s11 = int_to_ptr.hbm [resolvable:$true] %s1507_s11 }
  0x11   : > { %s2205_s17 = sshra.s32 (!%p142_p9), %s1508_s11, 4  ;;  %s2206_s17 = int_to_ptr.hbm [resolvable:$true] %s2205_s17 }
  0x12   : > { %p2212_p0 = scmp.lt.s32.totalorder (!%p142_p9), %s2206_s17, %s2677_s3 }
  0x13   : > { %v2013_v0 = vld [vmem:[%s2675_s1 + $0x38] sm:$0xff]  ;;  %v2012_v4 = vld [vmem:[%s2675_s1 + $0x30] sm:$0xff]  ;;  %v2011_v8 = vld [vmem:[%s2675_s1 + $0x28] sm:$0xff]  ;;  %s2685_s9 = smov (!%p166_p10, %s1575_s9), 31 }
  0x14   : > { %v2021_v1 = vld [vmem:[%s2675_s1 + $0x78] sm:$0xff]  ;;  %492 = vmatpush.bf16.xpose.msra.mxu0 %v2013_v0  ;;  %v2020_v5 = vld [vmem:[%s2675_s1 + $0x70] sm:$0xff]  ;;  %v2019_v9 = vld [vmem:[%s2675_s1 + $0x68] sm:$0xff]  ;;  %s1576_s26 = sshll.u32 %s2685_s9, 2  ;;  %s162_s9 = sand.u32 1, %s2245_s13  }
  0x15   : > { %v2029_v2 = vld [vmem:[%s2675_s1 + $0xb8] sm:$0xff]  ;;  %541 = vmatpush.bf16.xpose.msra.mxu1 %v2021_v1  ;;  %v2028_v6 = vld [vmem:[%s2675_s1 + $0xb0] sm:$0xff]  ;;  %v2027_v10 = vld [vmem:[%s2675_s1 + $0xa8] sm:$0xff]  ;;  %s2437_s29 = scalar_lea.vmem %s2674_s0, %s1576_s26  ;;  %s1574_s30 = sshll.u32 %s162_s9, 6 }
  0x16   : > { %v2037_v3 = vld [vmem:[%s2675_s1 + $0xf8] sm:$0xff]  ;;  %590 = vmatpush.bf16.xpose.msra.mxu2 %v2029_v2  ;;  %v2036_v7 = vld [vmem:[%s2675_s1 + $0xf0] sm:$0xff]  ;;  %v2035_v11 = vld [vmem:[%s2675_s1 + $0xe8] sm:$0xff]  ;;  %s2630_s4 = scalar_lea.vmem [#allocation3], %s1574_s30  ;;  %s1493_s16 = scalar_lea.sflag [#allocation4], %s162_s9 }
  0x17   : > { %639 = vmatpush.bf16.xpose.msra.mxu3 %v2037_v3  ;;  %v2010_v12 = vld [vmem:[%s2675_s1 + $0x20] sm:$0xff]  ;;  %v2009_v16 = vld [vmem:[%s2675_s1 + $0x18] sm:$0xff]  ;;  %v2008_v20 = vld [vmem:[%s2675_s1 + $0x10] sm:$0xff]  ;;  %s1505_s10 = sshll.u32 %s2630_s4, 4  ;;  %s1506_s10 = int_to_ptr.vmem [resolvable:$true] %s1505_s10 }
  0x18   : > { %v2018_v13 = vld [vmem:[%s2675_s1 + $0x60] sm:$0xff]  ;;  %v2017_v17 = vld [vmem:[%s2675_s1 + $0x58] sm:$0xff]  ;;  %v2016_v21 = vld [vmem:[%s2675_s1 + $0x50] sm:$0xff] }
  0x19   : > { %v2026_v14 = vld [vmem:[%s2675_s1 + $0xa0] sm:$0xff]  ;;  %v2025_v18 = vld [vmem:[%s2675_s1 + $0x98] sm:$0xff]  ;;  %v2024_v22 = vld [vmem:[%s2675_s1 + $0x90] sm:$0xff] }
  0x1a   : > { %v2034_v15 = vld [vmem:[%s2675_s1 + $0xe0] sm:$0xff]  ;;  %v2033_v19 = vld [vmem:[%s2675_s1 + $0xd8] sm:$0xff]  ;;  %v2032_v23 = vld [vmem:[%s2675_s1 + $0xd0] sm:$0xff] }
  0x1b   : > { %v2007_v24 = vld [vmem:[%s2675_s1 + $0x8] sm:$0xff]  ;;  %v2101_v29 = vld [vmem:[%s2676_s2 + $0xf4] sm:$0xf0]  ;;  %v1989_v31 = vld [vmem:[%s2676_s2 + $0xf8] sm:$0xf0] }
  0x1c   : > { %493 = vmatpush.bf16.xpose.msra.mxu0 %v2012_v4  ;;  %v2015_v25 = vld [vmem:[%s2675_s1 + $0x48] sm:$0xff]  ;;  %v2006_v32 = vld [vmem:[%s2675_s1] sm:$0xff]  ;;  %v2100_v40 = vld [vmem:[%s2676_s2 + $0xec] sm:$0xf0] }
  0x1d   : > { %542 = vmatpush.bf16.xpose.msra.mxu1 %v2020_v5  ;;  %v2023_v26 = vld [vmem:[%s2675_s1 + $0x88] sm:$0xff]  ;;  %v2014_v33 = vld [vmem:[%s2675_s1 + $0x40] sm:$0xff]  ;;  %v1981_v43 = vld [vmem:[%s2676_s2 + $0xf0] sm:$0xf0] }
  0x1e   : > { %591 = vmatpush.bf16.xpose.msra.mxu2 %v2028_v6  ;;  %v2031_v27 = vld [vmem:[%s2675_s1 + $0xc8] sm:$0xff]  ;;  %v2022_v34 = vld [vmem:[%s2675_s1 + $0x80] sm:$0xff]  ;;  %v2097_v45 = vld [vmem:[%s2676_s2 + $0xd4] sm:$0xf0] }
  0x1f   : > { %640 = vmatpush.bf16.xpose.msra.mxu3 %v2036_v7  ;;  %v1987_v28 = vld [vmem:[%s2676_s2 + $0xe8] sm:$0xf]  ;;  %v2099_v30 = vld [vmem:[%s2676_s2 + $0xec] sm:$0xf]  ;;  %v2030_v35 = vld [vmem:[%s2675_s1 + $0xc0] sm:$0xff] }
  0x20   : > { %v1988_v36 = vor.u32 %v2101_v29, %v1987_v28  ;;  %v1992_v37 = vor.u32 %v2099_v30, %v1989_v31  ;;  %v1998_v38 = vld [vmem:[%s2437_s29] sm:$0xff]  ;;  %v1971_v44 = vld [vmem:[%s2676_s2 + $0xc8] sm:$0xf]  ;;  %v2095_v48 = vld [vmem:[%s2676_s2 + $0xcc] sm:$0xf] }
  0x21   : > { %v1979_v39 = vld [vmem:[%s2676_s2 + $0xe0] sm:$0xf]  ;;  %v2098_v41 = vld [vmem:[%s2676_s2 + $0xe4] sm:$0xf]  ;;  %v1972_v47 = vor.u32 %v2097_v45, %v1971_v44  ;;  %v1973_v49 = vld [vmem:[%s2676_s2 + $0xd8] sm:$0xf0] }
  0x22   : > { %v1980_v42 = vor.u32 %v2100_v40, %v1979_v39  ;;  %v1984_v46 = vor.u32 %v2098_v41, %v1981_v43  ;;  %v1976_v50 = vor.u32 %v2095_v48, %v1973_v49  ;;  %v1999_v51 = vld [vmem:[%s2437_s29 + $0x8] sm:$0xff]  ;;  %v1963_v52 = vld [vmem:[%s2676_s2 + $0xc0] sm:$0xf]  ;;  %v2096_v53 = vld [vmem:[%s2676_s2 + $0xcc] sm:$0xf0] }
  0x23   : > { %v2094_v54 = vld [vmem:[%s2676_s2 + $0xc4] sm:$0xf]  ;;  %v1964_v55 = vor.u32 %v2096_v53, %v1963_v52  ;;  %v1965_v56 = vld [vmem:[%s2676_s2 + $0xd0] sm:$0xf0]  ;;  %v1955_v57 = vld [vmem:[%s2676_s2 + $0xa8] sm:$0xf] }
  0x24   : > { %494 = vmatpush.bf16.xpose.msra.mxu0 %v2011_v8  ;;  %v2093_v58 = vld [vmem:[%s2676_s2 + $0xb4] sm:$0xf0]  ;;  %v1968_v59 = vor.u32 %v2094_v54, %v1965_v56  ;;  %v2091_v61 = vld [vmem:[%s2676_s2 + $0xac] sm:$0xf]  ;;  %v1957_v62 = vld [vmem:[%s2676_s2 + $0xb8] sm:$0xf0] }
  0x25   : > { %543 = vmatpush.bf16.xpose.msra.mxu1 %v2019_v9  ;;  %v1956_v60 = vor.u32 %v2093_v58, %v1955_v57  ;;  %v1960_v63 = vor.u32 %v2091_v61, %v1957_v62  ;;  %v2000_v0 = vld [vmem:[%s2437_s29 + $0x10] sm:$0xff]  ;;  %v1947_v1 = vld [vmem:[%s2676_s2 + $0xa0] sm:$0xf]  ;;  %v2090_v3 = vld [vmem:[%s2676_s2 + $0xa4] sm:$0xf] }
  0x26   : > { %592 = vmatpush.bf16.xpose.msra.mxu2 %v2027_v10  ;;  %v2092_v2 = vld [vmem:[%s2676_s2 + $0xac] sm:$0xf0]  ;;  %v1949_v5 = vld [vmem:[%s2676_s2 + $0xb0] sm:$0xf0]  ;;  %v1939_v6 = vld [vmem:[%s2676_s2 + $0x88] sm:$0xf] }
  0x27   : > { %641 = vmatpush.bf16.xpose.msra.mxu3 %v2035_v11  ;;  %v1948_v4 = vor.u32 %v2092_v2, %v1947_v1  ;;  %v2089_v7 = vld [vmem:[%s2676_s2 + $0x94] sm:$0xf0]  ;;  %v1952_v8 = vor.u32 %v2090_v3, %v1949_v5  ;;  %v2087_v10 = vld [vmem:[%s2676_s2 + $0x8c] sm:$0xf]  ;;  %v1941_v11 = vld [vmem:[%s2676_s2 + $0x98] sm:$0xf0] }
  0x28   : > { %v1940_v9 = vor.u32 %v2089_v7, %v1939_v6  ;;  %v2084_v28 = vld [vmem:[%s2676_s2 + $0x6c] sm:$0xf0]  ;;  %v2082_v29 = vld [vmem:[%s2676_s2 + $0x64] sm:$0xf]  ;;  %v1917_v31 = vld [vmem:[%s2676_s2 + $0x70] sm:$0xf0] }
  0x29   : > { %v2003_v39 = vld [vmem:[%s2437_s29 + $0x28] sm:$0xff]  ;;  %v1899_v40 = vld [vmem:[%s2676_s2 + $0x40] sm:$0xf]  ;;  %v2080_v41 = vld [vmem:[%s2676_s2 + $0x4c] sm:$0xf0] }
  0x2a   : > { %v1900_v43 = vor.u32 %v2080_v41, %v1899_v40  ;;  %v1901_v44 = vld [vmem:[%s2676_s2 + $0x50] sm:$0xf0]  ;;  %v1891_v45 = vld [vmem:[%s2676_s2 + $0x28] sm:$0xf]  ;;  %v1883_v52 = vld [vmem:[%s2676_s2 + $0x20] sm:$0xf] }
  0x2b   : > { %v2004_v49 = vld [vmem:[%s2437_s29 + $0x30] sm:$0xff]  ;;  %v2070_v62 = vld [vmem:[%s2676_s2 + $0x4] sm:$0xf]  ;;  %v1875_v2 = vld [vmem:[%s2676_s2 + $0x8] sm:$0xf] }
  0x2c   : > { %495 = vmatpush.bf16.xpose.msra.mxu0 %v2010_v12  ;;  %v1944_v12 = vor.u32 %v2087_v10, %v1941_v11  ;;  %v2076_v54 = vld [vmem:[%s2676_s2 + $0x2c] sm:$0xf0]  ;;  %v1885_v56 = vld [vmem:[%s2676_s2 + $0x30] sm:$0xf0]  ;;  %v2073_v3 = vld [vmem:[%s2676_s2 + $0x14] sm:$0xf0] }
  0x2d   : > { %544 = vmatpush.bf16.xpose.msra.mxu1 %v2018_v13  ;;  %v2001_v13 = vld [vmem:[%s2437_s29 + $0x18] sm:$0xff]  ;;  %v1884_v57 = vor.u32 %v2076_v54, %v1883_v52  ;;  %v2072_v61 = vld [vmem:[%s2676_s2 + $0xc] sm:$0xf0]  ;;  %v1876_v5 = vor.u32 %v2073_v3, %v1875_v2 }
  0x2e   : > { %593 = vmatpush.bf16.xpose.msra.mxu2 %v2026_v14  ;;  %v1931_v14 = vld [vmem:[%s2676_s2 + $0x80] sm:$0xf]  ;;  %v1877_v6 = vld [vmem:[%s2676_s2 + $0x18] sm:$0xf0] }
  0x2f   : > { %642 = vmatpush.bf16.xpose.msra.mxu3 %v2034_v15  ;;  %v2088_v15 = vld [vmem:[%s2676_s2 + $0x8c] sm:$0xf0] }
  0x34   : > { %496 = vmatpush.bf16.xpose.msra.mxu0 %v2009_v16  ;;  %v2086_v16 = vld [vmem:[%s2676_s2 + $0x84] sm:$0xf] }
  0x35   : > { %545 = vmatpush.bf16.xpose.msra.mxu1 %v2017_v17  ;;  %v1932_v17 = vor.u32 %v2088_v15, %v1931_v14 }
  0x36   : > { %594 = vmatpush.bf16.xpose.msra.mxu2 %v2025_v18  ;;  %v1933_v18 = vld [vmem:[%s2676_s2 + $0x90] sm:$0xf0] }
  0x37   : > { %643 = vmatpush.bf16.xpose.msra.mxu3 %v2033_v19  ;;  %v1923_v19 = vld [vmem:[%s2676_s2 + $0x68] sm:$0xf] }
  0x3c   : > { %497 = vmatpush.bf16.xpose.msra.mxu0 %v2008_v20  ;;  %v2085_v20 = vld [vmem:[%s2676_s2 + $0x74] sm:$0xf0] }
  0x3d   : > { %546 = vmatpush.bf16.xpose.msra.mxu1 %v2016_v21  ;;  %v1936_v21 = vor.u32 %v2086_v16, %v1933_v18 }
  0x3e   : > { %595 = vmatpush.bf16.xpose.msra.mxu2 %v2024_v22  ;;  %v1924_v22 = vor.u32 %v2085_v20, %v1923_v19 }
  0x3f   : > { %644 = vmatpush.bf16.xpose.msra.mxu3 %v2032_v23  ;;  %v2083_v23 = vld [vmem:[%s2676_s2 + $0x6c] sm:$0xf] }
  0x44   : > { %498 = vmatpush.bf16.xpose.msra.mxu0 %v2007_v24  ;;  %v1925_v24 = vld [vmem:[%s2676_s2 + $0x78] sm:$0xf0] }
  0x45   : > { %547 = vmatpush.bf16.xpose.msra.mxu1 %v2015_v25  ;;  %v1928_v25 = vor.u32 %v2083_v23, %v1925_v24 }
  0x46   : > { %596 = vmatpush.bf16.xpose.msra.mxu2 %v2023_v26  ;;  %v2002_v26 = vld [vmem:[%s2437_s29 + $0x20] sm:$0xff] }
  0x47   : > { %645 = vmatpush.bf16.xpose.msra.mxu3 %v2031_v27  ;;  %v1915_v27 = vld [vmem:[%s2676_s2 + $0x60] sm:$0xf] }
  0x48   : > { %v1916_v30 = vor.u32 %v2084_v28, %v1915_v27 }
  0x4c   : > { %499 = vmatpush.bf16.xpose.msra.mxu0 %v2006_v32  ;;  %v1907_v32 = vld [vmem:[%s2676_s2 + $0x48] sm:$0xf] }
  0x4d   : > { %548 = vmatpush.bf16.xpose.msra.mxu1 %v2014_v33  ;;  %v2081_v33 = vld [vmem:[%s2676_s2 + $0x54] sm:$0xf0] }
  0x4e   : > { %597 = vmatpush.bf16.xpose.msra.mxu2 %v2022_v34  ;;  %v1920_v34 = vor.u32 %v2082_v29, %v1917_v31 }
  0x4f   : > { %646 = vmatpush.bf16.xpose.msra.mxu3 %v2030_v35  ;;  %v1908_v35 = vor.u32 %v2081_v33, %v1907_v32 }
  0x53   : > { %500 = vmatmul.bf16.vlgmr.msra.gmra.mxu0 %v1998_v38 }
  0x54   : > { %549 = vmatmul.bf16.vlgmr.msra.gmra.mxu1 %v1998_v38  ;;  %1264 = vmatpush.bf16.xpose.msrb.mxu0 %v1980_v42  ;;  %v2078_v42 = vld [vmem:[%s2676_s2 + $0x44] sm:$0xf] }
  0x55   : > { %598 = vmatmul.bf16.vlgmr.msra.gmra.mxu2 %v1998_v38  ;;  %1313 = vmatpush.bf16.xpose.msrb.mxu1 %v1984_v46  ;;  %v2077_v46 = vld [vmem:[%s2676_s2 + $0x34] sm:$0xf0] }
  0x56   : > { %1362 = vmatpush.bf16.xpose.msrb.mxu2 %v1988_v36  ;;  %647 = vmatmul.bf16.vlgmr.msra.gmra.mxu3 %v1998_v38  ;;  %v2079_v36 = vld [vmem:[%s2676_s2 + $0x4c] sm:$0xf]  ;;  %v1892_v48 = vor.u32 %v2077_v46, %v1891_v45 }
  0x57   : > { %1411 = vmatpush.bf16.xpose.msrb.mxu3 %v1992_v37  ;;  %v1909_v37 = vld [vmem:[%s2676_s2 + $0x58] sm:$0xf0] }
  0x58   : > { %v1912_v38 = vor.u32 %v2079_v36, %v1909_v37 }
  0x5c   : > { %1265 = vmatpush.bf16.xpose.msrb.mxu0 %v1964_v55  ;;  %v2074_v55 = vld [vmem:[%s2676_s2 + $0x24] sm:$0xf] }
  0x5d   : > { %1314 = vmatpush.bf16.xpose.msrb.mxu1 %v1968_v59  ;;  %v1888_v58 = vor.u32 %v2074_v55, %v1885_v56  ;;  %v2005_v59 = vld [vmem:[%s2437_s29 + $0x38] sm:$0xff]  ;;  %s2207_s29 = scalar_lea.hbm %s2206_s17, 64 }
  0x5e   : > { %1363 = vmatpush.bf16.xpose.msrb.mxu2 %v1972_v47  ;;  %v1904_v47 = vor.u32 %v2078_v42, %v1901_v44  ;;  %p2208_p11 = scmp.ne.s32.totalorder %s2206_s17, %s2207_s29  ;;  %p2213_p1 = scmp.lt.s32.totalorder %s2211_s24, %s2207_s29 }
  0x5f   : > { %1412 = vmatpush.bf16.xpose.msrb.mxu3 %v1976_v50  ;;  %v2075_v50 = vld [vmem:[%s2676_s2 + $0x2c] sm:$0xf] }
  0x60   : > { %p2209_p12 = pnand %p2208_p11, %p2315_p5  ;;  %p2214_p2 = por %p2213_p1, %p2212_p0 }
  0x62   : > { %p2210_p13 = pneg %p2209_p12 }
  0x63   : > { %505 = vmatmul.bf16.gmra.mxu0 %v1999_v51 }
  0x64   : > { %554 = vmatmul.bf16.gmra.mxu1 %v1999_v51  ;;  %1266 = vmatpush.bf16.xpose.msrb.mxu0 %v1948_v4  ;;  %v2071_v4 = vld [vmem:[%s2676_s2 + $0xc] sm:$0xf]  ;;  %p2215_p3 = pnand %p2214_p2, %p2210_p13 }
  0x65   : > { %603 = vmatmul.bf16.gmra.mxu2 %v1999_v51  ;;  %1315 = vmatpush.bf16.xpose.msrb.mxu1 %v1952_v8  ;;  %v1880_v7 = vor.u32 %v2071_v4, %v1877_v6 }
  0x66   : > { %652 = vmatmul.bf16.gmra.mxu3 %v1999_v51  ;;  %1364 = vmatpush.bf16.xpose.msrb.mxu2 %v1956_v60  ;;  %v1893_v51 = vld [vmem:[%s2676_s2 + $0x38] sm:$0xf0]  ;;  %v1867_v60 = vld [vmem:[%s2676_s2] sm:$0xf] }
  0x67   : > { %1413 = vmatpush.bf16.xpose.msrb.mxu3 %v1960_v63  ;;  %v1896_v53 = vor.u32 %v2075_v50, %v1893_v51  ;;  %v1868_v63 = vor.u32 %v2072_v61, %v1867_v60 }
  0x6c   : > { %1267 = vmatpush.bf16.xpose.msrb.mxu0 %v1932_v17 }
  0x6d   : > { %1316 = vmatpush.bf16.xpose.msrb.mxu1 %v1936_v21 }
  0x6e   : > { %1365 = vmatpush.bf16.xpose.msrb.mxu2 %v1940_v9 }
  0x6f   : > { %1414 = vmatpush.bf16.xpose.msrb.mxu3 %v1944_v12 }
  0x73   : > { %510 = vmatmul.bf16.gmra.mxu0 %v2000_v0 }
  0x74   : > { %559 = vmatmul.bf16.gmra.mxu1 %v2000_v0  ;;  %1268 = vmatpush.bf16.xpose.msrb.mxu0 %v1916_v30 }
  0x75   : > { %608 = vmatmul.bf16.gmra.mxu2 %v2000_v0  ;;  %1317 = vmatpush.bf16.xpose.msrb.mxu1 %v1920_v34 }
  0x76   : > { %657 = vmatmul.bf16.gmra.mxu3 %v2000_v0  ;;  %1366 = vmatpush.bf16.xpose.msrb.mxu2 %v1924_v22  ;;  %v1869_v0 = vld [vmem:[%s2676_s2 + $0x10] sm:$0xf0] }
  0x77   : > { %1415 = vmatpush.bf16.xpose.msrb.mxu3 %v1928_v25  ;;  %v1872_v1 = vor.u32 %v2070_v62, %v1869_v0 }
  0x7c   : > { %1269 = vmatpush.bf16.xpose.msrb.mxu0 %v1900_v43 }
  0x7d   : > { %1318 = vmatpush.bf16.xpose.msrb.mxu1 %v1904_v47 }
  0x7e   : > { %1367 = vmatpush.bf16.xpose.msrb.mxu2 %v1908_v35 }
  0x7f   : > { %1416 = vmatpush.bf16.xpose.msrb.mxu3 %v1912_v38 }
  0x83   : > { %515 = vmatmul.bf16.gmra.mxu0 %v2001_v13 }
  0x84   : > { %564 = vmatmul.bf16.gmra.mxu1 %v2001_v13  ;;  %1270 = vmatpush.bf16.xpose.msrb.mxu0 %v1884_v57 }
  0x85   : > { %613 = vmatmul.bf16.gmra.mxu2 %v2001_v13  ;;  %1319 = vmatpush.bf16.xpose.msrb.mxu1 %v1888_v58 }
  0x86   : > { %662 = vmatmul.bf16.gmra.mxu3 %v2001_v13  ;;  %1368 = vmatpush.bf16.xpose.msrb.mxu2 %v1892_v48 }
  0x87   : > { %1417 = vmatpush.bf16.xpose.msrb.mxu3 %v1896_v53 }
  0x8c   : > { %1271 = vmatpush.bf16.xpose.msrb.mxu0 %v1868_v63 }
  0x8d   : > { %1320 = vmatpush.bf16.xpose.msrb.mxu1 %v1872_v1 }
  0x8e   : > { %1369 = vmatpush.bf16.xpose.msrb.mxu2 %v1876_v5 }
  0x8f   : > { %1418 = vmatpush.bf16.xpose.msrb.mxu3 %v1880_v7 }
  0x93   : > { %520 = vmatmul.bf16.gmra.mxu0 %v2002_v26 }
  0x94   : > { %569 = vmatmul.bf16.gmra.mxu1 %v2002_v26 }
  0x95   : > { %618 = vmatmul.bf16.gmra.mxu2 %v2002_v26 }
  0x96   : > { %667 = vmatmul.bf16.gmra.mxu3 %v2002_v26 }
  0xa3   : > { %525 = vmatmul.bf16.gmra.mxu0 %v2003_v39 }
  0xa4   : > { %574 = vmatmul.bf16.gmra.mxu1 %v2003_v39 }
  0xa5   : > { %623 = vmatmul.bf16.gmra.mxu2 %v2003_v39 }
  0xa6   : > { %672 = vmatmul.bf16.gmra.mxu3 %v2003_v39 }
  0xb3   : > { %530 = vmatmul.bf16.gmra.mxu0 %v2004_v49 }
  0xb4   : > { %579 = vmatmul.bf16.gmra.mxu1 %v2004_v49 }
  0xb5   : > { %628 = vmatmul.bf16.gmra.mxu2 %v2004_v49 }
  0xb6   : > { %677 = vmatmul.bf16.gmra.mxu3 %v2004_v49 }
  0xc3   : > { %535 = vmatmul.bf16.gmra.mxu0 %v2005_v59 }
  0xc4   : > { %584 = vmatmul.bf16.gmra.mxu1 %v2005_v59 }
  0xc5   : > { %633 = vmatmul.bf16.gmra.mxu2 %v2005_v59 }
  0xc6   : > { %682 = vmatmul.bf16.gmra.mxu3 %v2005_v59 }
  0xd0   : > { %v501_v8 = vpop.f32.mrf.mxu0 }
  0xd1   : > { %v550_v9 = vpop.f32.mrf.mxu1  ;;  %v688_v10 = vmax.f32 %v501_v8, 0.0 }
  0xd2   : > { %v689_v11 = vmax.f32 %v550_v9, 0.0 }
  0xd3   : > { %v752_v12 = vmul.f32 %v688_v10, %v688_v10 }
  0xd4   : > { %v753_v13 = vmul.f32 %v689_v11, %v689_v11 }
  0xd6   : > { %v816_v14 = vpack.c.bf16 %v753_v13, %v752_v12 }
  0xd8   : > { %848 = vst [vmem:[#allocation2] sm:$0xff] %v816_v14  ;;  %v599_v15 = vpop.f32.mrf.mxu2  ;;  %v503_v19 = vpop.f32.mrf.mxu0 }
  0xd9   : > { %v648_v16 = vpop.f32.mrf.mxu3  ;;  %v690_v17 = vmax.f32 %v599_v15, 0.0  ;;  %v552_v20 = vpop.f32.mrf.mxu1  ;;  %v692_v21 = vmax.f32 %v503_v19, 0.0 }
  0xda   : > { %v691_v18 = vmax.f32 %v648_v16, 0.0  ;;  %v693_v22 = vmax.f32 %v552_v20, 0.0 }
  0xdb   : > { %v754_v23 = vmul.f32 %v690_v17, %v690_v17  ;;  %v756_v25 = vmul.f32 %v692_v21, %v692_v21 }
  0xdc   : > { %v755_v24 = vmul.f32 %v691_v18, %v691_v18  ;;  %v757_v26 = vmul.f32 %v693_v22, %v693_v22 }
  0xde   : > { %v817_v27 = vpack.c.bf16 %v755_v24, %v754_v23  ;;  %v818_v28 = vpack.c.bf16 %v757_v26, %v756_v25 }
  0xdf   : > { %v1739_v42 = vld [vmem:[#allocation2] sm:$0xf]  ;;  %v2038_v43 = vld [vmem:[#allocation2 + $0x4] sm:$0xf] }
  0xe0   : > { %849 = vst [vmem:[#allocation2 + $0x8] sm:$0xff] %v817_v27  ;;  %v601_v29 = vpop.f32.mrf.mxu2  ;;  %v506_v33 = vpop.f32.mrf.mxu0 }
  0xe1   : > { %850 = vst [vmem:[#allocation2 + $0x10] sm:$0xff] %v818_v28  ;;  %v650_v30 = vpop.f32.mrf.mxu3  ;;  %v694_v31 = vmax.f32 %v601_v29, 0.0  ;;  %v555_v34 = vpop.f32.mrf.mxu1  ;;  %v696_v35 = vmax.f32 %v506_v33, 0.0 }
  0xe2   : > { %v695_v32 = vmax.f32 %v650_v30, 0.0  ;;  %v697_v36 = vmax.f32 %v555_v34, 0.0 }
  0xe3   : > { %v758_v37 = vmul.f32 %v694_v31, %v694_v31  ;;  %v760_v39 = vmul.f32 %v696_v35, %v696_v35 }
  0xe4   : > { %v759_v38 = vmul.f32 %v695_v32, %v695_v32  ;;  %v761_v40 = vmul.f32 %v697_v36, %v697_v36 }
  0xe6   : > { %v819_v41 = vpack.c.bf16 %v759_v38, %v758_v37  ;;  %v820_v44 = vpack.c.bf16 %v761_v40, %v760_v39 }
  0xe7   : > { %v1747_v62 = vld [vmem:[#allocation2 + $0x8] sm:$0xf]  ;;  %v2039_v1 = vld [vmem:[#allocation2 + $0xc] sm:$0xf] }
  0xe8   : > { %851 = vst [vmem:[#allocation2 + $0x18] sm:$0xff] %v819_v41  ;;  %v2040_v45 = vld [vmem:[#allocation2 + $0xc] sm:$0xf0]  ;;  %v1741_v46 = vld [vmem:[#allocation2 + $0x10] sm:$0xf0]  ;;  %v604_v47 = vpop.f32.mrf.mxu2  ;;  %v508_v53 = vpop.f32.mrf.mxu0 }
  0xe9   : > { %852 = vst [vmem:[#allocation2 + $0x20] sm:$0xff] %v820_v44  ;;  %v653_v48 = vpop.f32.mrf.mxu3  ;;  %v1740_v49 = vor.u32 %v2040_v45, %v1739_v42  ;;  %v1744_v50 = vor.u32 %v2038_v43, %v1741_v46  ;;  %v698_v51 = vmax.f32 %v604_v47, 0.0  ;;  %v557_v54 = vpop.f32.mrf.mxu1  ;;  %v700_v55 = vmax.f32 %v508_v53, 0.0 }
  0xea   : > { %v699_v52 = vmax.f32 %v653_v48, 0.0  ;;  %v701_v56 = vmax.f32 %v557_v54, 0.0 }
  0xeb   : > { %1272 = vmatmul.bf16.vlgmr.msrb.gmra.mxu0 %v1740_v49  ;;  %1321 = vmatmul.bf16.vlgmr.msrb.gmra.mxu1 %v1744_v50  ;;  %v762_v57 = vmul.f32 %v698_v51, %v698_v51  ;;  %v764_v59 = vmul.f32 %v700_v55, %v700_v55 }
  0xec   : > { %v763_v58 = vmul.f32 %v699_v52, %v699_v52  ;;  %v765_v60 = vmul.f32 %v701_v56, %v701_v56 }
  0xee   : > { %v821_v61 = vpack.c.bf16 %v763_v58, %v762_v57  ;;  %v822_v63 = vpack.c.bf16 %v765_v60, %v764_v59 }
  0xef   : > { %v2041_v0 = vld [vmem:[#allocation2 + $0x14] sm:$0xf0]  ;;  %v1749_v2 = vld [vmem:[#allocation2 + $0x18] sm:$0xf0] }
  0xf0   : > { %853 = vst [vmem:[#allocation2 + $0x28] sm:$0xff] %v821_v61  ;;  %v1748_v3 = vor.u32 %v2041_v0, %v1747_v62  ;;  %v1752_v4 = vor.u32 %v2039_v1, %v1749_v2  ;;  %v606_v5 = vpop.f32.mrf.mxu2  ;;  %v511_v9 = vpop.f32.mrf.mxu0  ;;  %v1755_v18 = vld [vmem:[#allocation2 + $0x20] sm:$0xf]  ;;  %v2042_v19 = vld [vmem:[#allocation2 + $0x24] sm:$0xf] }
  0xf1   : > { %854 = vst [vmem:[#allocation2 + $0x30] sm:$0xff] %v822_v63  ;;  %v655_v6 = vpop.f32.mrf.mxu3  ;;  %v702_v7 = vmax.f32 %v606_v5, 0.0  ;;  %v560_v10 = vpop.f32.mrf.mxu1  ;;  %v704_v11 = vmax.f32 %v511_v9, 0.0 }
  0xf2   : > { %v703_v8 = vmax.f32 %v655_v6, 0.0  ;;  %1370 = vmatmul.bf16.vlgmr.msrb.gmra.mxu2 %v1748_v3  ;;  %1419 = vmatmul.bf16.vlgmr.msrb.gmra.mxu3 %v1752_v4  ;;  %v705_v12 = vmax.f32 %v560_v10, 0.0 }
  0xf3   : > { %v766_v13 = vmul.f32 %v702_v7, %v702_v7  ;;  %v768_v15 = vmul.f32 %v704_v11, %v704_v11 }
  0xf4   : > { %v767_v14 = vmul.f32 %v703_v8, %v703_v8  ;;  %v769_v16 = vmul.f32 %v705_v12, %v705_v12 }
  0xf6   : > { %v823_v17 = vpack.c.bf16 %v767_v14, %v766_v13  ;;  %v824_v20 = vpack.c.bf16 %v769_v16, %v768_v15 }
  0xf7   : > { %v1763_v38 = vld [vmem:[#allocation2 + $0x28] sm:$0xf]  ;;  %v2043_v41 = vld [vmem:[#allocation2 + $0x2c] sm:$0xf] }
  0xf8   : > { %855 = vst [vmem:[#allocation2 + $0x38] sm:$0xff] %v823_v17  ;;  %v2044_v21 = vld [vmem:[#allocation2 + $0x2c] sm:$0xf0]  ;;  %v1757_v22 = vld [vmem:[#allocation2 + $0x30] sm:$0xf0]  ;;  %v609_v23 = vpop.f32.mrf.mxu2  ;;  %v513_v29 = vpop.f32.mrf.mxu0 }
  0xf9   : > { %856 = vst [vmem:[#allocation2 + $0x40] sm:$0xff] %v824_v20  ;;  %v658_v24 = vpop.f32.mrf.mxu3  ;;  %v1756_v25 = vor.u32 %v2044_v21, %v1755_v18  ;;  %v1760_v26 = vor.u32 %v2042_v19, %v1757_v22  ;;  %v706_v27 = vmax.f32 %v609_v23, 0.0  ;;  %v562_v30 = vpop.f32.mrf.mxu1  ;;  %v708_v31 = vmax.f32 %v513_v29, 0.0 }
  0xfa   : > { %v707_v28 = vmax.f32 %v658_v24, 0.0  ;;  %v709_v32 = vmax.f32 %v562_v30, 0.0 }
  0xfb   : > { %1277 = vmatmul.bf16.gmra.mxu0 %v1756_v25  ;;  %1326 = vmatmul.bf16.gmra.mxu1 %v1760_v26  ;;  %v770_v33 = vmul.f32 %v706_v27, %v706_v27  ;;  %v772_v35 = vmul.f32 %v708_v31, %v708_v31 }
  0xfc   : > { %v771_v34 = vmul.f32 %v707_v28, %v707_v28  ;;  %v773_v36 = vmul.f32 %v709_v32, %v709_v32 }
  0xfe   : > { %v825_v37 = vpack.c.bf16 %v771_v34, %v770_v33  ;;  %v826_v39 = vpack.c.bf16 %v773_v36, %v772_v35 }
  0xff   : > { %v2045_v40 = vld [vmem:[#allocation2 + $0x34] sm:$0xf0]  ;;  %v1765_v42 = vld [vmem:[#allocation2 + $0x38] sm:$0xf0] }
 0x100   : > { %857 = vst [vmem:[#allocation2 + $0x48] sm:$0xff] %v825_v37  ;;  %v1764_v43 = vor.u32 %v2045_v40, %v1763_v38  ;;  %v1768_v44 = vor.u32 %v2043_v41, %v1765_v42  ;;  %v611_v45 = vpop.f32.mrf.mxu2  ;;  %v516_v49 = vpop.f32.mrf.mxu0  ;;  %v1771_v58 = vld [vmem:[#allocation2 + $0x40] sm:$0xf]  ;;  %v2046_v59 = vld [vmem:[#allocation2 + $0x44] sm:$0xf] }
 0x101   : > { %858 = vst [vmem:[#allocation2 + $0x50] sm:$0xff] %v826_v39  ;;  %v660_v46 = vpop.f32.mrf.mxu3  ;;  %v710_v47 = vmax.f32 %v611_v45, 0.0  ;;  %v565_v50 = vpop.f32.mrf.mxu1  ;;  %v712_v51 = vmax.f32 %v516_v49, 0.0 }
 0x102   : > { %v711_v48 = vmax.f32 %v660_v46, 0.0  ;;  %1375 = vmatmul.bf16.gmra.mxu2 %v1764_v43  ;;  %1424 = vmatmul.bf16.gmra.mxu3 %v1768_v44  ;;  %v713_v52 = vmax.f32 %v565_v50, 0.0 }
 0x103   : > { %v774_v53 = vmul.f32 %v710_v47, %v710_v47  ;;  %v776_v55 = vmul.f32 %v712_v51, %v712_v51 }
 0x104   : > { %v775_v54 = vmul.f32 %v711_v48, %v711_v48  ;;  %v777_v56 = vmul.f32 %v713_v52, %v713_v52 }
 0x106   : > { %v827_v57 = vpack.c.bf16 %v775_v54, %v774_v53  ;;  %v828_v60 = vpack.c.bf16 %v777_v56, %v776_v55 }
 0x107   : > { %v1779_v14 = vld [vmem:[#allocation2 + $0x48] sm:$0xf]  ;;  %v2047_v17 = vld [vmem:[#allocation2 + $0x4c] sm:$0xf] }
 0x108   : > { %859 = vst [vmem:[#allocation2 + $0x58] sm:$0xff] %v827_v57  ;;  %v2048_v61 = vld [vmem:[#allocation2 + $0x4c] sm:$0xf0]  ;;  %v1773_v62 = vld [vmem:[#allocation2 + $0x50] sm:$0xf0]  ;;  %v614_v63 = vpop.f32.mrf.mxu2  ;;  %v518_v5 = vpop.f32.mrf.mxu0 }
 0x109   : > { %860 = vst [vmem:[#allocation2 + $0x60] sm:$0xff] %v828_v60  ;;  %v663_v0 = vpop.f32.mrf.mxu3  ;;  %v1772_v1 = vor.u32 %v2048_v61, %v1771_v58  ;;  %v1776_v2 = vor.u32 %v2046_v59, %v1773_v62  ;;  %v714_v3 = vmax.f32 %v614_v63, 0.0  ;;  %v567_v6 = vpop.f32.mrf.mxu1  ;;  %v716_v7 = vmax.f32 %v518_v5, 0.0 }
 0x10a   : > { %v715_v4 = vmax.f32 %v663_v0, 0.0  ;;  %v717_v8 = vmax.f32 %v567_v6, 0.0 }
 0x10b   : > { %1282 = vmatmul.bf16.gmra.mxu0 %v1772_v1  ;;  %1331 = vmatmul.bf16.gmra.mxu1 %v1776_v2  ;;  %v778_v9 = vmul.f32 %v714_v3, %v714_v3  ;;  %v780_v11 = vmul.f32 %v716_v7, %v716_v7 }
 0x10c   : > { %v779_v10 = vmul.f32 %v715_v4, %v715_v4  ;;  %v781_v12 = vmul.f32 %v717_v8, %v717_v8 }
 0x10e   : > { %v829_v13 = vpack.c.bf16 %v779_v10, %v778_v9  ;;  %v830_v15 = vpack.c.bf16 %v781_v12, %v780_v11 }
 0x10f   : > { %v2049_v16 = vld [vmem:[#allocation2 + $0x54] sm:$0xf0]  ;;  %v1781_v18 = vld [vmem:[#allocation2 + $0x58] sm:$0xf0] }
 0x110   : > { %861 = vst [vmem:[#allocation2 + $0x68] sm:$0xff] %v829_v13  ;;  %v1780_v19 = vor.u32 %v2049_v16, %v1779_v14  ;;  %v1784_v20 = vor.u32 %v2047_v17, %v1781_v18  ;;  %v616_v21 = vpop.f32.mrf.mxu2  ;;  %v521_v25 = vpop.f32.mrf.mxu0  ;;  %v1787_v34 = vld [vmem:[#allocation2 + $0x60] sm:$0xf]  ;;  %v2050_v35 = vld [vmem:[#allocation2 + $0x64] sm:$0xf] }
 0x111   : > { %862 = vst [vmem:[#allocation2 + $0x70] sm:$0xff] %v830_v15  ;;  %v665_v22 = vpop.f32.mrf.mxu3  ;;  %v718_v23 = vmax.f32 %v616_v21, 0.0  ;;  %v570_v26 = vpop.f32.mrf.mxu1  ;;  %v720_v27 = vmax.f32 %v521_v25, 0.0 }
 0x112   : > { %v719_v24 = vmax.f32 %v665_v22, 0.0  ;;  %1380 = vmatmul.bf16.gmra.mxu2 %v1780_v19  ;;  %1429 = vmatmul.bf16.gmra.mxu3 %v1784_v20  ;;  %v721_v28 = vmax.f32 %v570_v26, 0.0 }
 0x113   : > { %v782_v29 = vmul.f32 %v718_v23, %v718_v23  ;;  %v784_v31 = vmul.f32 %v720_v27, %v720_v27 }
 0x114   : > { %v783_v30 = vmul.f32 %v719_v24, %v719_v24  ;;  %v785_v32 = vmul.f32 %v721_v28, %v721_v28 }
 0x116   : > { %v831_v33 = vpack.c.bf16 %v783_v30, %v782_v29  ;;  %v832_v36 = vpack.c.bf16 %v785_v32, %v784_v31 }
 0x117   : > { %v1795_v54 = vld [vmem:[#allocation2 + $0x68] sm:$0xf]  ;;  %v2051_v57 = vld [vmem:[#allocation2 + $0x6c] sm:$0xf] }
 0x118   : > { %863 = vst [vmem:[#allocation2 + $0x78] sm:$0xff] %v831_v33  ;;  %v2052_v37 = vld [vmem:[#allocation2 + $0x6c] sm:$0xf0]  ;;  %v1789_v38 = vld [vmem:[#allocation2 + $0x70] sm:$0xf0]  ;;  %v619_v39 = vpop.f32.mrf.mxu2  ;;  %v523_v45 = vpop.f32.mrf.mxu0 }
 0x119   : > { %864 = vst [vmem:[#allocation2 + $0x80] sm:$0xff] %v832_v36  ;;  %v668_v40 = vpop.f32.mrf.mxu3  ;;  %v1788_v41 = vor.u32 %v2052_v37, %v1787_v34  ;;  %v1792_v42 = vor.u32 %v2050_v35, %v1789_v38  ;;  %v722_v43 = vmax.f32 %v619_v39, 0.0  ;;  %v572_v46 = vpop.f32.mrf.mxu1  ;;  %v724_v47 = vmax.f32 %v523_v45, 0.0 }
 0x11a   : > { %v723_v44 = vmax.f32 %v668_v40, 0.0  ;;  %v725_v48 = vmax.f32 %v572_v46, 0.0 }
 0x11b   : > { %1287 = vmatmul.bf16.gmra.mxu0 %v1788_v41  ;;  %1336 = vmatmul.bf16.gmra.mxu1 %v1792_v42  ;;  %v786_v49 = vmul.f32 %v722_v43, %v722_v43  ;;  %v788_v51 = vmul.f32 %v724_v47, %v724_v47 }
 0x11c   : > { %v787_v50 = vmul.f32 %v723_v44, %v723_v44  ;;  %v789_v52 = vmul.f32 %v725_v48, %v725_v48 }
 0x11e   : > { %v833_v53 = vpack.c.bf16 %v787_v50, %v786_v49  ;;  %v834_v55 = vpack.c.bf16 %v789_v52, %v788_v51 }
 0x11f   : > { %v2053_v56 = vld [vmem:[#allocation2 + $0x74] sm:$0xf0]  ;;  %v1797_v58 = vld [vmem:[#allocation2 + $0x78] sm:$0xf0] }
 0x120   : > { %865 = vst [vmem:[#allocation2 + $0x88] sm:$0xff] %v833_v53  ;;  %v1796_v59 = vor.u32 %v2053_v56, %v1795_v54  ;;  %v1800_v60 = vor.u32 %v2051_v57, %v1797_v58  ;;  %v621_v61 = vpop.f32.mrf.mxu2  ;;  %v526_v1 = vpop.f32.mrf.mxu0  ;;  %v1803_v10 = vld [vmem:[#allocation2 + $0x80] sm:$0xf]  ;;  %v2054_v11 = vld [vmem:[#allocation2 + $0x84] sm:$0xf] }
 0x121   : > { %866 = vst [vmem:[#allocation2 + $0x90] sm:$0xff] %v834_v55  ;;  %v670_v62 = vpop.f32.mrf.mxu3  ;;  %v726_v63 = vmax.f32 %v621_v61, 0.0  ;;  %v575_v2 = vpop.f32.mrf.mxu1  ;;  %v728_v3 = vmax.f32 %v526_v1, 0.0 }
 0x122   : > { %v727_v0 = vmax.f32 %v670_v62, 0.0  ;;  %1385 = vmatmul.bf16.gmra.mxu2 %v1796_v59  ;;  %1434 = vmatmul.bf16.gmra.mxu3 %v1800_v60  ;;  %v729_v4 = vmax.f32 %v575_v2, 0.0 }
 0x123   : > { %v790_v5 = vmul.f32 %v726_v63, %v726_v63  ;;  %v792_v7 = vmul.f32 %v728_v3, %v728_v3 }
 0x124   : > { %v791_v6 = vmul.f32 %v727_v0, %v727_v0  ;;  %v793_v8 = vmul.f32 %v729_v4, %v729_v4 }
 0x126   : > { %v835_v9 = vpack.c.bf16 %v791_v6, %v790_v5  ;;  %v836_v12 = vpack.c.bf16 %v793_v8, %v792_v7 }
 0x127   : > { %v1811_v30 = vld [vmem:[#allocation2 + $0x88] sm:$0xf]  ;;  %v2055_v33 = vld [vmem:[#allocation2 + $0x8c] sm:$0xf] }
 0x128   : > { %867 = vst [vmem:[#allocation2 + $0x98] sm:$0xff] %v835_v9  ;;  %v2056_v13 = vld [vmem:[#allocation2 + $0x8c] sm:$0xf0]  ;;  %v1805_v14 = vld [vmem:[#allocation2 + $0x90] sm:$0xf0]  ;;  %v624_v15 = vpop.f32.mrf.mxu2  ;;  %v528_v21 = vpop.f32.mrf.mxu0 }
 0x129   : > { %868 = vst [vmem:[#allocation2 + $0xa0] sm:$0xff] %v836_v12  ;;  %v673_v16 = vpop.f32.mrf.mxu3  ;;  %v1804_v17 = vor.u32 %v2056_v13, %v1803_v10  ;;  %v1808_v18 = vor.u32 %v2054_v11, %v1805_v14  ;;  %v730_v19 = vmax.f32 %v624_v15, 0.0  ;;  %v577_v22 = vpop.f32.mrf.mxu1  ;;  %v732_v23 = vmax.f32 %v528_v21, 0.0 }
 0x12a   : > { %v731_v20 = vmax.f32 %v673_v16, 0.0  ;;  %v733_v24 = vmax.f32 %v577_v22, 0.0 }
 0x12b   : > { %1292 = vmatmul.bf16.gmra.mxu0 %v1804_v17  ;;  %1341 = vmatmul.bf16.gmra.mxu1 %v1808_v18  ;;  %v794_v25 = vmul.f32 %v730_v19, %v730_v19  ;;  %v796_v27 = vmul.f32 %v732_v23, %v732_v23 }
 0x12c   : > { %v795_v26 = vmul.f32 %v731_v20, %v731_v20  ;;  %v797_v28 = vmul.f32 %v733_v24, %v733_v24 }
 0x12e   : > { %v837_v29 = vpack.c.bf16 %v795_v26, %v794_v25  ;;  %v838_v31 = vpack.c.bf16 %v797_v28, %v796_v27 }
 0x12f   : > { %v2057_v32 = vld [vmem:[#allocation2 + $0x94] sm:$0xf0]  ;;  %v1813_v34 = vld [vmem:[#allocation2 + $0x98] sm:$0xf0] }
 0x130   : > { %869 = vst [vmem:[#allocation2 + $0xa8] sm:$0xff] %v837_v29  ;;  %v1812_v35 = vor.u32 %v2057_v32, %v1811_v30  ;;  %v1816_v36 = vor.u32 %v2055_v33, %v1813_v34  ;;  %v626_v37 = vpop.f32.mrf.mxu2  ;;  %v531_v41 = vpop.f32.mrf.mxu0  ;;  %v1819_v50 = vld [vmem:[#allocation2 + $0xa0] sm:$0xf]  ;;  %v2058_v51 = vld [vmem:[#allocation2 + $0xa4] sm:$0xf] }
 0x131   : > { %870 = vst [vmem:[#allocation2 + $0xb0] sm:$0xff] %v838_v31  ;;  %v675_v38 = vpop.f32.mrf.mxu3  ;;  %v734_v39 = vmax.f32 %v626_v37, 0.0  ;;  %v580_v42 = vpop.f32.mrf.mxu1  ;;  %v736_v43 = vmax.f32 %v531_v41, 0.0 }
 0x132   : > { %v735_v40 = vmax.f32 %v675_v38, 0.0  ;;  %1390 = vmatmul.bf16.gmra.mxu2 %v1812_v35  ;;  %1439 = vmatmul.bf16.gmra.mxu3 %v1816_v36  ;;  %v737_v44 = vmax.f32 %v580_v42, 0.0 }
 0x133   : > { %v798_v45 = vmul.f32 %v734_v39, %v734_v39  ;;  %v800_v47 = vmul.f32 %v736_v43, %v736_v43 }
 0x134   : > { %v799_v46 = vmul.f32 %v735_v40, %v735_v40  ;;  %v801_v48 = vmul.f32 %v737_v44, %v737_v44 }
 0x136   : > { %v839_v49 = vpack.c.bf16 %v799_v46, %v798_v45  ;;  %v840_v52 = vpack.c.bf16 %v801_v48, %v800_v47 }
 0x137   : > { %v1827_v6 = vld [vmem:[#allocation2 + $0xa8] sm:$0xf]  ;;  %v2059_v9 = vld [vmem:[#allocation2 + $0xac] sm:$0xf] }
 0x138   : > { %871 = vst [vmem:[#allocation2 + $0xb8] sm:$0xff] %v839_v49  ;;  %v2060_v53 = vld [vmem:[#allocation2 + $0xac] sm:$0xf0]  ;;  %v1821_v54 = vld [vmem:[#allocation2 + $0xb0] sm:$0xf0]  ;;  %v629_v55 = vpop.f32.mrf.mxu2  ;;  %v533_v61 = vpop.f32.mrf.mxu0 }
 0x139   : > { %872 = vst [vmem:[#allocation2 + $0xc0] sm:$0xff] %v840_v52  ;;  %v678_v56 = vpop.f32.mrf.mxu3  ;;  %v1820_v57 = vor.u32 %v2060_v53, %v1819_v50  ;;  %v1824_v58 = vor.u32 %v2058_v51, %v1821_v54  ;;  %v738_v59 = vmax.f32 %v629_v55, 0.0  ;;  %v582_v62 = vpop.f32.mrf.mxu1  ;;  %v740_v63 = vmax.f32 %v533_v61, 0.0 }
 0x13a   : > { %v739_v60 = vmax.f32 %v678_v56, 0.0  ;;  %v741_v0 = vmax.f32 %v582_v62, 0.0 }
 0x13b   : > { %1297 = vmatmul.bf16.gmra.mxu0 %v1820_v57  ;;  %1346 = vmatmul.bf16.gmra.mxu1 %v1824_v58  ;;  %v802_v1 = vmul.f32 %v738_v59, %v738_v59  ;;  %v804_v3 = vmul.f32 %v740_v63, %v740_v63 }
 0x13c   : > { %v803_v2 = vmul.f32 %v739_v60, %v739_v60  ;;  %v805_v4 = vmul.f32 %v741_v0, %v741_v0 }
 0x13e   : > { %v841_v5 = vpack.c.bf16 %v803_v2, %v802_v1  ;;  %v842_v7 = vpack.c.bf16 %v805_v4, %v804_v3 }
 0x13f   : > { %v2061_v8 = vld [vmem:[#allocation2 + $0xb4] sm:$0xf0]  ;;  %v1829_v10 = vld [vmem:[#allocation2 + $0xb8] sm:$0xf0] }
 0x140   : > { %873 = vst [vmem:[#allocation2 + $0xc8] sm:$0xff] %v841_v5  ;;  %v1828_v11 = vor.u32 %v2061_v8, %v1827_v6  ;;  %v1832_v12 = vor.u32 %v2059_v9, %v1829_v10  ;;  %v631_v13 = vpop.f32.mrf.mxu2  ;;  %v536_v17 = vpop.f32.mrf.mxu0  ;;  %v1835_v26 = vld [vmem:[#allocation2 + $0xc0] sm:$0xf]  ;;  %v2062_v27 = vld [vmem:[#allocation2 + $0xc4] sm:$0xf] }
 0x141   : > { %874 = vst [vmem:[#allocation2 + $0xd0] sm:$0xff] %v842_v7  ;;  %v680_v14 = vpop.f32.mrf.mxu3  ;;  %v742_v15 = vmax.f32 %v631_v13, 0.0  ;;  %v585_v18 = vpop.f32.mrf.mxu1  ;;  %v744_v19 = vmax.f32 %v536_v17, 0.0 }
 0x142   : > { %v743_v16 = vmax.f32 %v680_v14, 0.0  ;;  %1395 = vmatmul.bf16.gmra.mxu2 %v1828_v11  ;;  %1444 = vmatmul.bf16.gmra.mxu3 %v1832_v12  ;;  %v745_v20 = vmax.f32 %v585_v18, 0.0 }
 0x143   : > { %v806_v21 = vmul.f32 %v742_v15, %v742_v15  ;;  %v808_v23 = vmul.f32 %v744_v19, %v744_v19 }
 0x144   : > { %v807_v22 = vmul.f32 %v743_v16, %v743_v16  ;;  %v809_v24 = vmul.f32 %v745_v20, %v745_v20 }
 0x146   : > { %v843_v25 = vpack.c.bf16 %v807_v22, %v806_v21  ;;  %v844_v28 = vpack.c.bf16 %v809_v24, %v808_v23 }
 0x147   : > { %v1843_v46 = vld [vmem:[#allocation2 + $0xc8] sm:$0xf]  ;;  %v2063_v49 = vld [vmem:[#allocation2 + $0xcc] sm:$0xf] }
 0x148   : > { %875 = vst [vmem:[#allocation2 + $0xd8] sm:$0xff] %v843_v25  ;;  %v2064_v29 = vld [vmem:[#allocation2 + $0xcc] sm:$0xf0]  ;;  %v1837_v30 = vld [vmem:[#allocation2 + $0xd0] sm:$0xf0]  ;;  %v634_v31 = vpop.f32.mrf.mxu2  ;;  %v538_v37 = vpop.f32.mrf.mxu0 }
 0x149   : > { %876 = vst [vmem:[#allocation2 + $0xe0] sm:$0xff] %v844_v28  ;;  %v683_v32 = vpop.f32.mrf.mxu3  ;;  %v1836_v33 = vor.u32 %v2064_v29, %v1835_v26  ;;  %v1840_v34 = vor.u32 %v2062_v27, %v1837_v30  ;;  %v746_v35 = vmax.f32 %v634_v31, 0.0  ;;  %v587_v38 = vpop.f32.mrf.mxu1  ;;  %v748_v39 = vmax.f32 %v538_v37, 0.0 }
 0x14a   : > { %v747_v36 = vmax.f32 %v683_v32, 0.0  ;;  %v749_v40 = vmax.f32 %v587_v38, 0.0 }
 0x14b   : > { %1302 = vmatmul.bf16.gmra.mxu0 %v1836_v33  ;;  %1351 = vmatmul.bf16.gmra.mxu1 %v1840_v34  ;;  %v810_v41 = vmul.f32 %v746_v35, %v746_v35  ;;  %v812_v43 = vmul.f32 %v748_v39, %v748_v39 }
 0x14c   : > { %v811_v42 = vmul.f32 %v747_v36, %v747_v36  ;;  %v813_v44 = vmul.f32 %v749_v40, %v749_v40 }
 0x14e   : > { %v845_v45 = vpack.c.bf16 %v811_v42, %v810_v41  ;;  %v846_v47 = vpack.c.bf16 %v813_v44, %v812_v43 }
 0x14f   : > { %v2065_v48 = vld [vmem:[#allocation2 + $0xd4] sm:$0xf0]  ;;  %v1845_v50 = vld [vmem:[#allocation2 + $0xd8] sm:$0xf0] }
 0x150   : > { %877 = vst [vmem:[#allocation2 + $0xe8] sm:$0xff] %v845_v45  ;;  %v1844_v51 = vor.u32 %v2065_v48, %v1843_v46  ;;  %v1848_v52 = vor.u32 %v2063_v49, %v1845_v50  ;;  %v636_v53 = vpop.f32.mrf.mxu2  ;;  %v1851_v60 = vld [vmem:[#allocation2 + $0xe0] sm:$0xf]  ;;  %v2066_v61 = vld [vmem:[#allocation2 + $0xe4] sm:$0xf] }
 0x151   : > { %878 = vst [vmem:[#allocation2 + $0xf0] sm:$0xff] %v846_v47  ;;  %v685_v54 = vpop.f32.mrf.mxu3  ;;  %v750_v55 = vmax.f32 %v636_v53, 0.0 }
 0x152   : > { %v751_v56 = vmax.f32 %v685_v54, 0.0  ;;  %1400 = vmatmul.bf16.gmra.mxu2 %v1844_v51  ;;  %1449 = vmatmul.bf16.gmra.mxu3 %v1848_v52 }
 0x153   : > { %v814_v57 = vmul.f32 %v750_v55, %v750_v55 }
 0x154   : > { %v815_v58 = vmul.f32 %v751_v56, %v751_v56 }
 0x156   : > { %v847_v59 = vpack.c.bf16 %v815_v58, %v814_v57 }
 0x157   : > { %v1859_v2 = vld [vmem:[#allocation2 + $0xe8] sm:$0xf]  ;;  %v2067_v4 = vld [vmem:[#allocation2 + $0xec] sm:$0xf] }
 0x158   : > { %879 = vst [vmem:[#allocation2 + $0xf8] sm:$0xff] %v847_v59  ;;  %v2068_v62 = vld [vmem:[#allocation2 + $0xec] sm:$0xf0]  ;;  %v1853_v63 = vld [vmem:[#allocation2 + $0xf0] sm:$0xf0] }
 0x159   : > { %v1852_v0 = vor.u32 %v2068_v62, %v1851_v60  ;;  %v1856_v1 = vor.u32 %v2066_v61, %v1853_v63 }
 0x15b   : > { %1307 = vmatmul.bf16.gmra.mxu0 %v1852_v0  ;;  %1356 = vmatmul.bf16.gmra.mxu1 %v1856_v1 }
 0x15f   : > { %v2069_v3 = vld [vmem:[#allocation2 + $0xf4] sm:$0xf0]  ;;  %v1861_v5 = vld [vmem:[#allocation2 + $0xf8] sm:$0xf0] }
 0x160   : > { %v1860_v6 = vor.u32 %v2069_v3, %v1859_v2  ;;  %v1864_v7 = vor.u32 %v2067_v4, %v1861_v5 }
 0x162   : > { %1405 = vmatmul.bf16.gmra.mxu2 %v1860_v6  ;;  %1454 = vmatmul.bf16.gmra.mxu3 %v1864_v7 }
 0x168   : > { %v1273_v8 = vpop.f32.mrf.mxu0  ;;  %v1322_v9 = vpop.f32.mrf.mxu1 }
 0x169   : > { %v1323_v16 = vadd.f32 %v1322_v9, %v1273_v8 }
 0x170   : > { %v1275_v10 = vpop.f32.mrf.mxu0  ;;  %v1324_v11 = vpop.f32.mrf.mxu1 }
 0x171   : > { %v1325_v17 = vadd.f32 %v1324_v11, %v1275_v10 }
 0x175   : > { %v1371_v12 = vpop.f32.mrf.mxu2  ;;  %v1420_v13 = vpop.f32.mrf.mxu3 }
 0x176   : > { %v1372_v18 = vadd.f32 %v1371_v12, %v1323_v16 }
 0x178   : > { %v1278_v14 = vpop.f32.mrf.mxu0  ;;  %v1327_v15 = vpop.f32.mrf.mxu1  ;;  %v1421_v22 = vadd.f32 %v1420_v13, %v1372_v18 }
 0x179   : > { %v1328_v31 = vadd.f32 %v1327_v15, %v1278_v14 }
 0x17d   : > { %v1373_v19 = vpop.f32.mrf.mxu2  ;;  %v1422_v20 = vpop.f32.mrf.mxu3 }
 0x17e   : > { %v1374_v21 = vadd.f32 %v1373_v19, %v1325_v17 }
 0x180   : > { %v1423_v23 = vadd.f32 %v1422_v20, %v1374_v21  ;;  %v1280_v24 = vpop.f32.mrf.mxu0  ;;  %v1329_v25 = vpop.f32.mrf.mxu1 }
 0x181   : > { %v1330_v32 = vadd.f32 %v1329_v25, %v1280_v24 }
 0x182   : > { %v2106_v26 = vpack.c.bf16 %v1423_v23, %v1421_v22 }
 0x184   : > { %2107 = vst [vmem:[%s2630_s4] sm:$0xff] %v2106_v26  }
 0x185   : > { %v1376_v27 = vpop.f32.mrf.mxu2  ;;  %v1425_v28 = vpop.f32.mrf.mxu3 }
 0x186   : > { %v1377_v33 = vadd.f32 %v1376_v27, %v1328_v31 }
 0x188   : > { %v1283_v29 = vpop.f32.mrf.mxu0  ;;  %v1332_v30 = vpop.f32.mrf.mxu1  ;;  %v1426_v37 = vadd.f32 %v1425_v28, %v1377_v33 }
 0x189   : > { %v1333_v46 = vadd.f32 %v1332_v30, %v1283_v29 }
 0x18d   : > { %v1378_v34 = vpop.f32.mrf.mxu2  ;;  %v1427_v35 = vpop.f32.mrf.mxu3 }
 0x18e   : > { %v1379_v36 = vadd.f32 %v1378_v34, %v1330_v32 }
 0x190   : > { %v1428_v38 = vadd.f32 %v1427_v35, %v1379_v36  ;;  %v1285_v39 = vpop.f32.mrf.mxu0  ;;  %v1334_v40 = vpop.f32.mrf.mxu1 }
 0x191   : > { %v1335_v47 = vadd.f32 %v1334_v40, %v1285_v39 }
 0x192   : > { %v2111_v41 = vpack.c.bf16 %v1428_v38, %v1426_v37 }
 0x194   : > { %2143 = vst [vmem:[%s2630_s4 + $0x8] sm:$0xff] %v2111_v41  }
 0x195   : > { %v1381_v42 = vpop.f32.mrf.mxu2  ;;  %v1430_v43 = vpop.f32.mrf.mxu3 }
 0x196   : > { %v1382_v48 = vadd.f32 %v1381_v42, %v1333_v46 }
 0x198   : > { %v1288_v44 = vpop.f32.mrf.mxu0  ;;  %v1337_v45 = vpop.f32.mrf.mxu1  ;;  %v1431_v52 = vadd.f32 %v1430_v43, %v1382_v48 }
 0x199   : > { %v1338_v61 = vadd.f32 %v1337_v45, %v1288_v44 }
 0x19d   : > { %v1383_v49 = vpop.f32.mrf.mxu2  ;;  %v1432_v50 = vpop.f32.mrf.mxu3 }
 0x19e   : > { %v1384_v51 = vadd.f32 %v1383_v49, %v1335_v47 }
 0x1a0   : > { %v1433_v53 = vadd.f32 %v1432_v50, %v1384_v51  ;;  %v1290_v54 = vpop.f32.mrf.mxu0  ;;  %v1339_v55 = vpop.f32.mrf.mxu1 }
 0x1a1   : > { %v1340_v62 = vadd.f32 %v1339_v55, %v1290_v54 }
 0x1a2   : > { %v2116_v56 = vpack.c.bf16 %v1433_v53, %v1431_v52 }
 0x1a4   : > { %2144 = vst [vmem:[%s2630_s4 + $0x10] sm:$0xff] %v2116_v56  }
 0x1a5   : > { %v1386_v57 = vpop.f32.mrf.mxu2  ;;  %v1435_v58 = vpop.f32.mrf.mxu3 }
 0x1a6   : > { %v1387_v63 = vadd.f32 %v1386_v57, %v1338_v61 }
 0x1a8   : > { %v1293_v59 = vpop.f32.mrf.mxu0  ;;  %v1342_v60 = vpop.f32.mrf.mxu1  ;;  %v1436_v3 = vadd.f32 %v1435_v58, %v1387_v63 }
 0x1a9   : > { %v1343_v12 = vadd.f32 %v1342_v60, %v1293_v59 }
 0x1ad   : > { %v1388_v0 = vpop.f32.mrf.mxu2  ;;  %v1437_v1 = vpop.f32.mrf.mxu3 }
 0x1ae   : > { %v1389_v2 = vadd.f32 %v1388_v0, %v1340_v62 }
 0x1b0   : > { %v1438_v4 = vadd.f32 %v1437_v1, %v1389_v2  ;;  %v1295_v5 = vpop.f32.mrf.mxu0  ;;  %v1344_v6 = vpop.f32.mrf.mxu1 }
 0x1b1   : > { %v1345_v13 = vadd.f32 %v1344_v6, %v1295_v5 }
 0x1b2   : > { %v2121_v7 = vpack.c.bf16 %v1438_v4, %v1436_v3 }
 0x1b4   : > { %2145 = vst [vmem:[%s2630_s4 + $0x18] sm:$0xff] %v2121_v7  }
 0x1b5   : > { %v1391_v8 = vpop.f32.mrf.mxu2  ;;  %v1440_v9 = vpop.f32.mrf.mxu3 }
 0x1b6   : > { %v1392_v14 = vadd.f32 %v1391_v8, %v1343_v12 }
 0x1b8   : > { %v1298_v10 = vpop.f32.mrf.mxu0  ;;  %v1347_v11 = vpop.f32.mrf.mxu1  ;;  %v1441_v18 = vadd.f32 %v1440_v9, %v1392_v14 }
 0x1b9   : > { %v1348_v25 = vadd.f32 %v1347_v11, %v1298_v10 }
 0x1bd   : > { %v1393_v15 = vpop.f32.mrf.mxu2  ;;  %v1442_v16 = vpop.f32.mrf.mxu3 }
 0x1be   : > { %v1394_v17 = vadd.f32 %v1393_v15, %v1345_v13 }
 0x1c0   : > { %v1443_v19 = vadd.f32 %v1442_v16, %v1394_v17  ;;  %v1300_v20 = vpop.f32.mrf.mxu0  ;;  %v1349_v21 = vpop.f32.mrf.mxu1 }
 0x1c1   : > { %v1350_v28 = vadd.f32 %v1349_v21, %v1300_v20 }
 0x1c2   : > { %v2126_v22 = vpack.c.bf16 %v1443_v19, %v1441_v18 }
 0x1c4   : > { %2146 = vst [vmem:[%s2630_s4 + $0x20] sm:$0xff] %v2126_v22  }
 0x1c5   : > { %v1396_v23 = vpop.f32.mrf.mxu2  ;;  %v1445_v24 = vpop.f32.mrf.mxu3 }
 0x1c6   : > { %v1397_v29 = vadd.f32 %v1396_v23, %v1348_v25 }
 0x1c8   : > { %v1303_v26 = vpop.f32.mrf.mxu0  ;;  %v1352_v27 = vpop.f32.mrf.mxu1  ;;  %v1446_v33 = vadd.f32 %v1445_v24, %v1397_v29 }
 0x1c9   : > { %v1353_v40 = vadd.f32 %v1352_v27, %v1303_v26 }
 0x1cd   : > { %v1398_v30 = vpop.f32.mrf.mxu2  ;;  %v1447_v31 = vpop.f32.mrf.mxu3 }
 0x1ce   : > { %v1399_v32 = vadd.f32 %v1398_v30, %v1350_v28 }
 0x1d0   : > { %v1448_v34 = vadd.f32 %v1447_v31, %v1399_v32  ;;  %v1305_v36 = vpop.f32.mrf.mxu0  ;;  %v1354_v37 = vpop.f32.mrf.mxu1 }
 0x1d1   : > { %v1355_v41 = vadd.f32 %v1354_v37, %v1305_v36 }
 0x1d2   : > { %v2131_v35 = vpack.c.bf16 %v1448_v34, %v1446_v33 }
 0x1d4   : > { %2147 = vst [vmem:[%s2630_s4 + $0x28] sm:$0xff] %v2131_v35  }
 0x1d5   : > { %v1401_v38 = vpop.f32.mrf.mxu2  ;;  %v1450_v39 = vpop.f32.mrf.mxu3 }
 0x1d6   : > { %v1402_v42 = vadd.f32 %v1401_v38, %v1353_v40 }
 0x1d8   : > { %v1308_v46 = vpop.f32.mrf.mxu0  ;;  %v1357_v47 = vpop.f32.mrf.mxu1  ;;  %v1451_v48 = vadd.f32 %v1450_v39, %v1402_v42 }
 0x1d9   : > { %v1358_v55 = vadd.f32 %v1357_v47, %v1308_v46 }
 0x1dd   : > { %v1403_v43 = vpop.f32.mrf.mxu2  ;;  %v1452_v44 = vpop.f32.mrf.mxu3 }
 0x1de   : > { %v1404_v45 = vadd.f32 %v1403_v43, %v1355_v41 }
 0x1e0   : > { %v1453_v49 = vadd.f32 %v1452_v44, %v1404_v45  ;;  %v1310_v53 = vpop.f32.mrf.mxu0  ;;  %v1359_v54 = vpop.f32.mrf.mxu1 }
 0x1e1   : > { %v1360_v56 = vadd.f32 %v1359_v54, %v1310_v53 }
 0x1e2   : > { %v2136_v50 = vpack.c.bf16 %v1453_v49, %v1451_v48 }
 0x1e4   : > { %2148 = vst [vmem:[%s2630_s4 + $0x30] sm:$0xff] %v2136_v50  }
 0x1e5   : > { %v1406_v51 = vpop.f32.mrf.mxu2  ;;  %v1455_v52 = vpop.f32.mrf.mxu3 }
 0x1e6   : > { %v1407_v57 = vadd.f32 %v1406_v51, %v1358_v55 }
 0x1e8   : > { %v1456_v61 = vadd.f32 %v1455_v52, %v1407_v57 }
 0x1ed   : > { %v1408_v58 = vpop.f32.mrf.mxu2  ;;  %v1457_v60 = vpop.f32.mrf.mxu3 }
 0x1ee   : > { %v1409_v59 = vadd.f32 %v1408_v58, %v1360_v56 }
 0x1f0   : > { %v1458_v62 = vadd.f32 %v1457_v60, %v1409_v59 }
 0x1f2   : > { %v2141_v63 = vpack.c.bf16 %v1458_v62, %v1456_v61 }
 0x1f4   : > { %2149 = vst [vmem:[%s2630_s4 + $0x38] sm:$0xff] %v2141_v63  }
 0x1f5   : > { %2218 = shalt.err (!%p2215_p3)
}
 0x1f6   : > { %s2255_s27 = smov 64   ;;  %s2256_s28 = smov 4  }
 0x1f7   : > { %2150 = dma.vmem_to_hbm [thread:$0]  (%p2315_p5), %s1506_s10, 1024, %s1508_s11, %s1493_s16, %s2255_s27, %s2255_s27, %s2256_s28  }
 0x1f8 PF: > { %p2156_p4 = scmp.ge.s32.totalorder %s2253_s15, 2  ;;  %s1522_s9 = sand.u32 1, %s2241_s12  }
 0x1f9   : > { %s1523_s30 = scalar_lea.sflag [#allocation4], %s1522_s9 }
 0x1fa   : > { %p2153_p7 = pnand %p2156_p4, %p2319_p6 }
 0x1fc   : > { %p2154_p8 = pneg %p2153_p7 }
 0x1fe   : > { %2236 = dma.done.wait (%p2154_p8), %s1523_s30, 1024  }
 0x1ff   : > { %2238 = vsyncadd (%p2154_p8), %s1523_s30, 4294966272  ;;  %p13_p9 = scmp.ge.s32.totalorder %s2302_s18, 4   ;;  %s2680_s12 = smov %s2245_s13 }
 0x200   : > { %s2681_s13 = smov %s2249_s14  ;;  %s2682_s14 = smov %s2313_s21 }
 0x201   : > { %s2683_s15 = smov %s2302_s18  ;;  %15 = sbr.rel (!%p13_p9) target bundleno = 3 (0x3), region = 67 }
 0x206   :  { %1529 = vsyncpa [#allocation4], 1 }
 0x207   :  { %1531 = vsyncpa [#allocation4 + $0x1], 1 }

</bundles_post_ra>
